<compile_context>
chip_gen: v7x
topology: tpu7x:2x2x1
jax: 0.10.0
libtpu: 0.0.40
codegen_flags: <defaults>
</compile_context>

<pallas_src>
import jax
import jax.numpy as jnp
from jax import lax
from jax.experimental import pallas as pl
from jax.experimental.pallas import tpu as pltpu

LANE = 128  # TPU lane width / MXU alignment


def _round_up(v, m):
    return ((v + m - 1) // m) * m


def _pad2d(a, rows, cols, dtype=None):
    out = jnp.pad(a, ((0, rows - a.shape[0]), (0, cols - a.shape[1])))
    return out if dtype is None else out.astype(dtype)


def _largest_tile(size, candidates):
    """Largest candidate tile that evenly divides `size` (size is a multiple of 128)."""
    for c in candidates:
        if size % c == 0:
            return c
    return size


def _vmem_limit_bytes():
    """Generation-aware VMEM budget: ~3/4 of physical VMEM, capped at 110 MiB."""
    try:
        phys = int(pltpu.get_tpu_info().vmem_capacity_bytes)
    except Exception:
        phys = 64 * 1024 * 1024  # conservative (v7x-sized) fallback
    return min((phys * 3) // 4, 110 * 1024 * 1024)


# ---- kernel 1: h = relu(A_hat @ xw + b), row-tiled + K-tiled accumulator ------
def gcn_relu_kernel(a_ref, xw_ref, b_ref, h_ref, acc_ref):
    k = pl.program_id(1)

    @pl.when(k == 0)
    def _():
        acc_ref[...] = jnp.zeros_like(acc_ref)

    acc_ref[...] += jnp.dot(a_ref[...], xw_ref[...],
                            preferred_element_type=jnp.float32)

    @pl.when(k == pl.num_programs(1) - 1)
    def _():
        h = jnp.maximum(acc_ref[...] + b_ref[...], 0.0)  # bias + ReLU in f32
        # TODO(synk): dropout is identity in eval mode (training=False); a
        # training variant would build a keep mask with pltpu.prng_random_bits.
        h_ref[...] = h.astype(h_ref.dtype)


# ---- kernel 2: out = h @ h.T, 2-D output tiling, transpose-free ---------------
def gram_kernel(hi_ref, hj_ref, out_ref):
    # Contract over the last (hidden) dim of BOTH operands: no XLU relayout of h.
    out_ref[...] = lax.dot_general(
        hi_ref[...], hj_ref[...],
        dimension_numbers=(((1,), (1,)), ((), ())),
        preferred_element_type=jnp.float32)


def structure_decoder(x, a_hat, w, b):
    """x: (N, nhid) f32, a_hat: (N, N) normalized adjacency (any float dtype),
    w: (nhid, nhid) f32, b: (1, nhid) f32. Returns (N, N) f32 = h @ h.T."""
    n, nhid = x.shape
    n_pad = _round_up(max(n, LANE), LANE)
    h_pad = _round_up(max(nhid, LANE), LANE)

    # x @ W hoisted out of the per-tile loop (tiny, exact PyG GCNConv ordering).
    xw = jnp.dot(x, w, preferred_element_type=jnp.float32)          # (n, nhid)

    # Zero padding keeps the math exact: padded hidden cols of xw / b are zero
    # -> h[:, nhid:] == 0; padded node rows only touch out[n:, :] / out[:, n:],
    # which are sliced away.  Cast + pad fuse into a single XLA pass (pass
    # a_hat already in bf16 to skip even that).
    a_p = _pad2d(a_hat, n_pad, n_pad, jnp.bfloat16)
    xw_p = _pad2d(xw, n_pad, h_pad, jnp.bfloat16)
    b_p = _pad2d(b, 1, h_pad, jnp.float32)

    # ---- tile selection --------------------------------------------------
    tile_m = _largest_tile(n_pad, (512, 256, 128))        # GCN row tile
    if n_pad // tile_m == 1:
        tile_m = n_pad // 2     # >= 64, multiple of 8: keep both v7x TCs busy
    tk = _largest_tile(n_pad, (2048, 1024, 512, 256, 128))  # GCN contraction tile
    tile_g = _largest_tile(n_pad, (512, 256, 128))        # gram output tile

    grid_m = n_pad // tile_m
    grid_k = n_pad // tk
    grid_g = n_pad // tile_g
    vmem_cap = _vmem_limit_bytes()

    # ---- kernel 1: GCN layer + ReLU ---------------------------------------
    gcn_cost = pl.CostEstimate(
        flops=2 * n_pad * n_pad * h_pad,
        transcendentals=0,
        bytes_accessed=2 * a_p.size + 2 * xw_p.size * grid_m
        + 4 * b_p.size + 2 * n_pad * h_pad,
    )
    h_bf16 = pl.pallas_call(
        gcn_relu_kernel,
        out_shape=jax.ShapeDtypeStruct((n_pad, h_pad), jnp.bfloat16),
        grid=(grid_m, grid_k),
        in_specs=[
            pl.BlockSpec((tile_m, tk), lambda i, k: (i, k)),     # A_hat tile
            pl.BlockSpec((tk, h_pad), lambda i, k: (k, 0)),      # xw tile
            pl.BlockSpec((1, h_pad), lambda i, k: (0, 0)),       # bias
        ],
        out_specs=pl.BlockSpec((tile_m, h_pad), lambda i, k: (i, 0)),
        scratch_shapes=[pltpu.VMEM((tile_m, h_pad), jnp.float32)],
        compiler_params=pltpu.CompilerParams(
            dimension_semantics=("parallel", "arbitrary"),
            vmem_limit_bytes=vmem_cap),
        cost_estimate=gcn_cost,
    )(a_p, xw_p, b_p)

    # ---- kernel 2: gram matrix h @ h.T -------------------------------------
    gram_cost = pl.CostEstimate(
        flops=2 * n_pad * n_pad * h_pad,
        transcendentals=0,
        bytes_accessed=2 * 2 * n_pad * h_pad * grid_g + 4 * n_pad * n_pad,
    )
    out = pl.pallas_call(
        gram_kernel,
        out_shape=jax.ShapeDtypeStruct((n_pad, n_pad), jnp.float32),
        grid=(grid_g, grid_g),
        in_specs=[
            pl.BlockSpec((tile_g, h_pad), lambda i, j: (i, 0)),  # h rows (i tile)
            pl.BlockSpec((tile_g, h_pad), lambda i, j: (j, 0)),  # h rows (j tile)
        ],
        out_specs=pl.BlockSpec((tile_g, tile_g), lambda i, j: (i, j)),
        compiler_params=pltpu.CompilerParams(
            dimension_semantics=("parallel", "parallel"),
            vmem_limit_bytes=vmem_cap),
        cost_estimate=gram_cost,
    )(h_bf16, h_bf16)

    # TODO(synk): output kept in f32 to match module semantics; emit bf16 here
    # if the downstream loss tolerates it (halves the dominant byte stream).
    return out[:n, :n]


def gcn_normalize(edge_index, num_nodes, out_dtype=jnp.float32):
    """Dense symmetric GCN normalization with remaining self loops:
    A_hat = D^{-1/2} (A ∪ I) D^{-1/2} (matches PyG GCNConv defaults)."""
    src, dst = edge_index[0], edge_index[1]
    a = jnp.zeros((num_nodes, num_nodes), dtype=jnp.float32)
    a = a.at[src, dst].set(1.0)
    a = a.at[dst, src].set(1.0)  # treat as undirected like typical GAD pipelines
    # Keep pre-existing self loops at weight 1.0 (add_remaining_self_loops).
    a = jnp.maximum(a, jnp.eye(num_nodes, dtype=jnp.float32))
    deg = a.sum(axis=1)
    d_inv_sqrt = jnp.where(deg > 0, 1.0 / jnp.sqrt(deg), 0.0)
    return (d_inv_sqrt[:, None] * a * d_inv_sqrt[None, :]).astype(out_dtype)


if __name__ == "__main__":
    N = 16       # number of graph nodes
    NHID = 32    # hidden dimension of the decoder
    E = 40       # number of random edges

    key = jax.random.PRNGKey(0)
    kx, ke, kw, kb = jax.random.split(key, 4)

    # Node features (output of the shared encoder), float32.
    x = jax.random.normal(kx, (N, NHID), dtype=jnp.float32)

    # Random edge_index (2, E) with values in [0, N).
    edge_index = jax.random.randint(ke, (2, E), 0, N, dtype=jnp.int32)

    # Deterministic GCNConv parameters (glorot-ish scale), small nonzero bias
    # so the bias path is exercised.
    w = jax.random.normal(kw, (NHID, NHID), dtype=jnp.float32) * (1.0 / jnp.sqrt(NHID))
    b = 0.01 * jax.random.normal(kb, (1, NHID), dtype=jnp.float32)

    a_hat = gcn_normalize(edge_index, N)

    out = structure_decoder(x, a_hat, w, b)
    out = jax.block_until_ready(out)

    # Reference check in full f32 (kernel uses bf16 MXU inputs with f32
    # accumulation -> loosened tolerance).
    h_ref = jnp.maximum(a_hat @ (x @ w) + b, 0.0)
    ref = h_ref @ h_ref.T
    assert out.shape == (N, N)
    assert jnp.allclose(out, ref, atol=1e-1, rtol=5e-2), (
        float(jnp.max(jnp.abs(out - ref))))

    print("KERNEL_OK")
</pallas_src>

<mosaic_0001>
module attributes {stable_mosaic.version = 11 : i64} {
  func.func @gcn_relu_kernel(%arg0: i32, %arg1: i32, %arg2: memref<64x128xbf16, #tpu.memory_space<vmem>>, %arg3: memref<128x128xbf16, #tpu.memory_space<vmem>>, %arg4: memref<1x128xf32, #tpu.memory_space<vmem>>, %arg5: memref<64x128xbf16, #tpu.memory_space<vmem>>, %arg6: memref<64x128xf32, #tpu.memory_space<vmem>>) attributes {dimension_semantics = [#tpu.dimension_semantics<parallel>, #tpu.dimension_semantics<arbitrary>], iteration_bounds = array<i64: 2, 1>, scalar_prefetch = 0 : i64, scratch_operands = 1 : i64, tpu.core_type = #tpu.core_type<tc>, window_params = [{transform_indices = @transform_0, window_bounds = array<i64: 64, 128>}, {transform_indices = @transform_1, window_bounds = array<i64: 128, 128>}, {pipeline_mode = #tpu.pipeline_mode<synchronous>, transform_indices = @transform_2, window_bounds = array<i64: 1, 128>}, {transform_indices = @transform_3, window_bounds = array<i64: 64, 128>}]} {
    %c0_i32 = arith.constant 0 : i32
    %0 = arith.cmpi eq, %arg1, %c0_i32 : i32
    %1 = arith.extui %0 : i1 to i32
    %c0_i32_0 = arith.constant 0 : i32
    %2 = arith.cmpi ne, %1, %c0_i32_0 : i32
    scf.if %2 {
      %cst_10 = arith.constant 0.000000e+00 : f32
      %12 = vector.broadcast %cst_10 : f32 to vector<64x128xf32>
      %c0_11 = arith.constant 0 : index
      %c0_12 = arith.constant 0 : index
      %13 = vector.load %arg6[%c0_11, %c0_12] : memref<64x128xf32, #tpu.memory_space<vmem>>, vector<64x128xf32>
      tpu.vector_store %arg6[%c0_11, %c0_12], %12 {strides = array<i32>} : memref<64x128xf32, #tpu.memory_space<vmem>>, vector<64x128xf32>,
    } else {
    }
    %c0 = arith.constant 0 : index
    %c0_1 = arith.constant 0 : index
    %3 = vector.load %arg6[%c0, %c0_1] : memref<64x128xf32, #tpu.memory_space<vmem>>, vector<64x128xf32>
    %c0_2 = arith.constant 0 : index
    %c0_3 = arith.constant 0 : index
    %4 = vector.load %arg2[%c0_2, %c0_3] : memref<64x128xbf16, #tpu.memory_space<vmem>>, vector<64x128xbf16>
    %c0_4 = arith.constant 0 : index
    %c0_5 = arith.constant 0 : index
    %5 = vector.load %arg3[%c0_4, %c0_5] : memref<128x128xbf16, #tpu.memory_space<vmem>>, vector<128x128xbf16>
    %cst = arith.constant dense<0.000000e+00> : vector<64x128xf32>
    %6 = tpu.matmul %4, %5, %cst {dimension_numbers = #tpu.dot_dimension_numbers<[1], [0], [0], [1], [0, 0, 1, 1], [], []>} : vector<64x128xbf16>, vector<128x128xbf16>, vector<64x128xf32> -> vector<64x128xf32>
    %7 = arith.addf %3, %6 : vector<64x128xf32>
    %c0_6 = arith.constant 0 : index
    %c0_7 = arith.constant 0 : index
    %8 = vector.load %arg6[%c0_6, %c0_7] : memref<64x128xf32, #tpu.memory_space<vmem>>, vector<64x128xf32>
    tpu.vector_store %arg6[%c0_6, %c0_7], %7 {strides = array<i32>} : memref<64x128xf32, #tpu.memory_space<vmem>>, vector<64x128xf32>,
    %c0_i32_8 = arith.constant 0 : i32
    %9 = arith.cmpi eq, %arg1, %c0_i32_8 : i32
    %10 = arith.extui %9 : i1 to i32
    %c0_i32_9 = arith.constant 0 : i32
    %11 = arith.cmpi ne, %10, %c0_i32_9 : i32
    scf.if %11 {
      %c0_10 = arith.constant 0 : index
      %c0_11 = arith.constant 0 : index
      %12 = vector.load %arg6[%c0_10, %c0_11] : memref<64x128xf32, #tpu.memory_space<vmem>>, vector<64x128xf32>
      %c0_12 = arith.constant 0 : index
      %c0_13 = arith.constant 0 : index
      %13 = vector.load %arg4[%c0_12, %c0_13] : memref<1x128xf32, #tpu.memory_space<vmem>>, vector<1x128xf32>
      %14 = vector.broadcast %13 : vector<1x128xf32> to vector<64x128xf32>
      %15 = arith.addf %12, %14 : vector<64x128xf32>
      %cst_14 = arith.constant 0.000000e+00 : f32
      %16 = vector.broadcast %cst_14 : f32 to vector<64x128xf32>
      %17 = arith.maximumf %15, %16 : vector<64x128xf32>
      %18 = arith.truncf %17 : vector<64x128xf32> to vector<64x128xbf16>
      %c0_15 = arith.constant 0 : index
      %c0_16 = arith.constant 0 : index
      %19 = vector.load %arg5[%c0_15, %c0_16] : memref<64x128xbf16, #tpu.memory_space<vmem>>, vector<64x128xbf16>
      tpu.vector_store %arg5[%c0_15, %c0_16], %18 {strides = array<i32>} : memref<64x128xbf16, #tpu.memory_space<vmem>>, vector<64x128xbf16>,
    } else {
    }
    return
  }
  func.func @transform_0(%arg0: i32, %arg1: i32) -> (i32, i32) {
    %c0_i32 = arith.constant 0 : i32
    return %arg0, %arg1 : i32, i32
  }
  func.func @transform_1(%arg0: i32, %arg1: i32) -> (i32, i32) {
    %c0_i32 = arith.constant 0 : i32
    %c0_i32_0 = arith.constant 0 : i32
    return %arg1, %c0_i32 : i32, i32
  }
  func.func @transform_2(%arg0: i32, %arg1: i32) -> (i32, i32) {
    %c0_i32 = arith.constant 0 : i32
    %c0_i32_0 = arith.constant 0 : i32
    %c0_i32_1 = arith.constant 0 : i32
    return %c0_i32, %c0_i32_0 : i32, i32
  }
  func.func @transform_3(%arg0: i32, %arg1: i32) -> (i32, i32) {
    %c0_i32 = arith.constant 0 : i32
    %c0_i32_0 = arith.constant 0 : i32
    return %arg0, %c0_i32 : i32, i32
  }
}

</mosaic_0001>

<bundles_post_ra>
// kernel: tpu_custom_call.1
= control target key start
LH: loop header
LB: loop body
LE: loop exit
PB: predicated region body
PF: predicated region fallthrough
CT: control target
= control target key end

     0   :  { %8 = vsyncpa [#allocation4], 0  ;;  %s1234_s0 = inlined_call_operand.hbm [shape: bf16[128,128], index: 0, kind: input, shape index: {}]   ;;  %s1235_s1 = inlined_call_operand.hbm [shape: bf16[128,128], index: 1, kind: input, shape index: {}]   ;;  %s1236_s2 = inlined_call_operand.vmem [shape: f32[1,128], index: 2, kind: input, shape index: {}]   ;;  %s1237_s3 = inlined_call_operand.hbm [shape: bf16[128,128], index: 3, kind: output, shape index: {}]  }
   0x1   :  { %10 = vsyncpa [#allocation4 + $0x1], 0 }
   0x2   :  { %11 = vsyncpa [#allocation7], 0 }
   0x3   :  { %12 = vsyncpa [#allocation5], 0 }
   0x4   :  { %14 = vsyncpa [#allocation5 + $0x1], 0  ;;  %s996_s12 = smov 0   ;;  %s998_s13 = smov 0  }
   0x5   :  { %s1000_s14 = smov 0   ;;  %s1002_s15 = smov 0  }
   0x6   :  { %s1004_s16 = smov 0   ;;  %s1006_s17 = smov 0  }
   0x7 LB: > { %s611_s18 = sadd.s32 4294967295, %s967_s17   ;;  %s612_s19 = sadd.s32 4294967294, %s967_s17   ;;  %s967_s17 = sphi %s1006_s17, %s20_s17   ;;  %s963_s16 = sphi %s1004_s16, %s1261_s16   ;;  %s959_s15 = sphi %s1002_s15, %s1260_s15   ;;  %s955_s14 = sphi %s1000_s14, %s1259_s14   ;;  %s951_s13 = sphi %s998_s13, %s1258_s13   ;;  %s947_s12 = sphi %s996_s12, %s1257_s12  }
   0x8   : > { %p54_p0 = scmp.ne.s32.totalorder %s951_s13, %s947_s12  ;;  %p1030_p1 = scmp.eq.s32.totalorder %s611_s18, 0 }
   0x9   : > { %p1034_p2 = scmp.eq.s32.totalorder %s611_s18, 1  ;;  %p131_p3 = scmp.eq.s32.totalorder %s612_s19, 1 }
   0xa   : > { %s1242_s20 = scalar_select %p1030_p1, 1, 0 }
   0xb   : > { %s1243_s21 = scalar_select %p1034_p2, 1, 0 }
   0xc   : > { %p1040_p4 = por %p1030_p1, %p54_p0  ;;  %p613_p5 = scmp.ge.s32.totalorder %s967_s17, 1 }
   0xd   : > { %p1045_p6 = por %p131_p3, %p54_p0  ;;  %p138_p7 = scmp.lt.s32.totalorder %s967_s17, 3 }
   0xe   : > { %s1244_s22 = scalar_select %p1040_p4, 1, 0 }
   0xf   : > { %s1245_s23 = scalar_select %p1045_p6, 1, 0 }
  0x10   : > { %p1050_p8 = pnand %p613_p5, %p138_p7  ;;  %s969_s25 = smov [#allocation6]  }
  0x11   : > { %s153_s26 = sshll.u32 %s969_s25, 4  ;;  %s32_s28 = sadd.s32 1, %s963_s16  ;;  %s154_s26 = int_to_ptr.vmem [resolvable:$true] %s153_s26 }
  0x12   : > { %s1246_s24 = scalar_select %p1050_p8, 1, 0 }
  0x13   : > { %p742_p9 = pneg %p1050_p8  ;;  %s823_s4 = scalar_lea.hbm %s1235_s1, 1024 }
  0x14   : > { %p824_p12 = scmp.ne.s32.totalorder %s1235_s1, %s823_s4  ;;  %p830_p5 = scmp.lt.u32.totalorder %s823_s4, %s1235_s1 }
  0x15   : > { %p1059_p11 = pnand %p742_p9, %p1030_p1 }
  0x17   : > { %p825_p13 = pneg %p1059_p11 }
  0x19   : > { %p826_p0 = pnand %p825_p13, %p824_p12 }
  0x1b   : > { %p827_p3 = pneg %p826_p0 }
  0x1d   : > { %p832_p7 = pnand %p830_p5, %p827_p3 }
  0x1f   : > { %835 = shalt.err (!%p832_p7)
}
  0x20   : > { %s836_s9 = scalar_lea.vmem %s154_s26, 1024  ;;  %p844_p1 = scmp.lt.s32.totalorder %s154_s26, %s154_s26 }
  0x21   : > { %p837_p9 = scmp.ne.s32.totalorder %s154_s26, %s836_s9  ;;  %p845_p4 = scmp.lt.s32.totalorder %s836_s9, %s836_s9 }
  0x23   : > { %p839_p10 = pnand %p837_p9, %p825_p13  ;;  %p846_p8 = por %p845_p4, %p844_p1 }
  0x25   : > { %p840_p6 = pneg %p839_p10 }
  0x27   : > { %p847_p2 = pnand %p846_p8, %p840_p6 }
  0x29   : > { %850 = shalt.err (!%p847_p2)
}
  0x2a   : > { %s970_s10 = smov 64   ;;  %s971_s11 = smov 4  }
  0x2b   : > { %745 = dma.hbm_to_vmem [thread:$0]  (!%p1059_p11), %s1235_s1, 1024, %s154_s26, [#allocation7], %s970_s10, %s970_s10, %s971_s11  }
  0x2c   : > { %p34_p1 = scmp.ge.s32.totalorder %s32_s28, 2  ;;  %s41_s25 = sadd.s32 1, %s955_s14 }
  0x2d   : > { %p48_p2 = scmp.ne.s32.totalorder %s955_s14, %s951_s13  ;;  %p49_p4 = scmp.eq.s32.totalorder %s967_s17, 0 }
  0x2e   : > { %s1263_s28 = smov (%p34_p1, %s32_s28), 0  ;;  %p1249_p8 = scmp.ne.s32.totalorder %s1243_s21, 0 }
  0x2f   : > { %p1089_p6 = por %p49_p4, %p48_p2  ;;  %s36_s30 = ssub.s32 %s963_s16, %s1263_s28 }
  0x30   : > { %p1095_p10 = por %p1249_p8, %p48_p2  ;;  %p755_p12 = scmp.lt.s32.totalorder %s967_s17, 2 }
  0x31   : > { %p39_p11 = scmp.eq.s32.totalorder %s36_s30, 0  ;;  %s170_s26 = sand.u32 1, %s955_s14  }
  0x32   : > { %s616_s4 = sshll.u32 %s170_s26, 5  ;;  %s649_s6 = sshll.u32 %s963_s16, 9 }
  0x33   : > { %s1104_s5 = scalar_select %p39_p11, %s955_s14, %s41_s25  }
  0x34   : > { %s1110_s9 = scalar_lea.hbm %s1234_s0, %s649_s6  ;;  %s174_s21 = scalar_lea.vmem [#allocation3], %s616_s4 }
  0x35   : > { %s182_s18 = sshll.u32 %s174_s21, 4  ;;  %p1116_p13 = pnand %p755_p12, %p1089_p6  ;;  %s1112_s18 = int_to_ptr.vmem [resolvable:$true] %s182_s18 }
  0x36   : > { %s1120_s25 = scalar_lea.sflag [#allocation4], %s170_s26  ;;  %s851_s30 = scalar_lea.hbm %s1110_s9, 512 }
  0x37   : > { %p852_p0 = scmp.ne.s32.totalorder %s1110_s9, %s851_s30  ;;  %p853_p3 = pneg %p1116_p13 }
  0x38   : > { %s856_s29 = scalar_lea.hbm %s1234_s0, 1024  ;;  %p857_p9 = scmp.lt.u32.totalorder %s1110_s9, %s1234_s0 }
  0x39   : > { %p854_p5 = pnand %p853_p3, %p852_p0  ;;  %p858_p1 = scmp.lt.u32.totalorder %s856_s29, %s851_s30 }
  0x3a   : > { %p860_p4 = scmp.lt.u32.totalorder %s851_s30, %s1110_s9 }
  0x3b   : > { %p855_p7 = pneg %p854_p5  ;;  %p859_p2 = por %p858_p1, %p857_p9 }
  0x3d   : > { %p861_p6 = por %p860_p4, %p859_p2 }
  0x3f   : > { %p862_p8 = pnand %p861_p6, %p855_p7 }
  0x41   : > { %865 = shalt.err (!%p862_p8)
}
  0x42   : > { %s866_s26 = scalar_lea.vmem %s1112_s18, 512  ;;  %s972_s21 = smov [#allocation3]  }
  0x43   : > { %p867_p12 = scmp.ne.s32.totalorder %s1112_s18, %s866_s26  ;;  %s871_s4 = sshll.u32 %s972_s21, 4  ;;  %s872_s4 = int_to_ptr.vmem [resolvable:$false] %s871_s4 }
  0x44   : > { %s873_s6 = scalar_lea.vmem %s872_s4, 1024  ;;  %p874_p5 = scmp.lt.s32.totalorder %s1112_s18, %s872_s4 }
  0x45   : > { %p869_p11 = pnand %p867_p12, %p853_p3  ;;  %p875_p9 = scmp.lt.s32.totalorder %s873_s6, %s866_s26 }
  0x47   : > { %p870_p0 = pneg %p869_p11  ;;  %p876_p1 = por %p875_p9, %p874_p5 }
  0x49   : > { %p877_p2 = pnand %p876_p1, %p870_p0 }
  0x4b   : > { %880 = shalt.err (!%p877_p2)
}
  0x4c   : > { %749 = dma.hbm_to_vmem [thread:$0]  (!%p1116_p13), %s1110_s9, 512, %s1112_s18, %s1120_s25, %s970_s10, %s970_s10, %s971_s11  }
  0x4d   : > { %p1252_p3 = scmp.ne.s32.totalorder %s1246_s24, 0 }
  0x4e   : > { %s1154_s30 = sand.u32 (!%p1252_p3), 1, %s951_s13   ;;  %p1253_p7 = scmp.ne.s32.totalorder (!%p1252_p3), %s1244_s22, 0 }
  0x4f   : > { %194 = sbr.rel (%p1252_p3) target bundleno = 359 (0x167), region = 32  ;;  %s620_s29 = sshll.u32 (!%p1252_p3), %s1154_s30, 5 }
  0x50   : > { %s197_s7 = scalar_lea.sflag (!%p1252_p3), [#allocation4], %s1154_s30  ;;  %s1160_s19 = scalar_lea.vmem (!%p1252_p3), [#allocation3], %s620_s29 }
  0x56   : > { %934 = dma.done.wait (%p1253_p7), %s197_s7, 512  }
  0x57   : > { %936 = vsyncadd (%p1253_p7), %s197_s7, 4294966784  ;;  %p1254_p13 = scmp.ne.s32.totalorder %s1242_s20, 0 }
  0x59   : > { %938 = dma.done.wait (%p1254_p13), [#allocation7], 1024  }
  0x5a   : > { %940 = vsyncadd (%p1254_p13), [#allocation7], 4294966272  ;;  %v811_v0 = vld [vmem:[#allocation6] sm:$0xff]   ;;  %v812_v1 = vld [vmem:[#allocation6 + $0x8] sm:$0xff]   ;;  %s226_s24 = scalar_lea.vmem [#allocation8], %s620_s29  ;;  %s658_s11 = sshll.u32 %s959_s15, 9 }
  0x5b   : > { %694 = vmatprep.subr.bf16.mxu0 %v811_v0  ;;  %718 = vmatprep.subr.bf16.mxu1 %v811_v0  ;;  %v813_v2 = vld [vmem:[#allocation6 + $0x10] sm:$0xff]   ;;  %v814_v3 = vld [vmem:[#allocation6 + $0x18] sm:$0xff]   ;;  %v819_v4 = vld [vmem:[%s1160_s19] sm:$0xff]   ;;  %s516_s10 = sshll.u32 %s226_s24, 4  ;;  %s1185_s15 = scalar_lea.hbm %s1237_s3, %s658_s11  ;;  %s1180_s10 = int_to_ptr.vmem [resolvable:$true] %s516_s10 }
  0x5c   : > { %695 = vmatpush3.bf16.msra.mxu0 %v811_v0  ;;  %726 = vmatpush3.bf16.msra.mxu1 %v811_v0  ;;  %v820_v5 = vld [vmem:[%s1160_s19 + $0x10] sm:$0xff]   ;;  %v815_v6 = vld [vmem:[#allocation6 + $0x20] sm:$0xff]   ;;  %v816_v7 = vld [vmem:[#allocation6 + $0x28] sm:$0xff]   ;;  %s503_s25 = scalar_lea.sflag [#allocation5], %s1154_s30  ;;  %s881_s8 = scalar_lea.vmem %s1180_s10, 512 }
  0x5d   : > { %696 = vmatprep.subr.bf16.mxu0 %v812_v1  ;;  %719 = vmatprep.subr.bf16.mxu1 %v812_v1  ;;  %v817_v8 = vld [vmem:[#allocation6 + $0x30] sm:$0xff]   ;;  %v818_v9 = vld [vmem:[#allocation6 + $0x38] sm:$0xff]   ;;  %v821_v10 = vld [vmem:[%s1160_s19 + $0x8] sm:$0xff]   ;;  %p882_p4 = scmp.ne.s32.totalorder %s1180_s10, %s881_s8  ;;  %s973_s26 = smov [#allocation8]  }
  0x5e   : > { %710 = vmatprep.mubr.bf16.mxu0 %v819_v4  ;;  %714 = vmatprep.mubr.bf16.mxu1 %v820_v5  ;;  %v822_v11 = vld [vmem:[%s1160_s19 + $0x18] sm:$0xff]   ;;  %v635_v12 = vld [vmem:[%s1236_s2] ss:$0 sm:$0xff]  ;;  %s885_s21 = sshll.u32 %s973_s26, 4  ;;  %s886_s21 = int_to_ptr.vmem [resolvable:$false] %s885_s21 }
  0x5f   : > { %p883_p6 = pnand %p882_p4, %p1095_p10  ;;  %s887_s4 = scalar_lea.vmem %s886_s21, 1024 }
  0x60   : > { %697 = vmatpush3.bf16.msra.mxu0 %v812_v1  ;;  %727 = vmatpush3.bf16.msra.mxu1 %v812_v1  ;;  %p888_p12 = scmp.lt.s32.totalorder %s1180_s10, %s886_s21  ;;  %p889_p11 = scmp.lt.s32.totalorder %s887_s4, %s881_s8 }
  0x61   : > { %698 = vmatprep.subr.bf16.mxu0 %v813_v2  ;;  %720 = vmatprep.subr.bf16.mxu1 %v813_v2  ;;  %p884_p8 = pneg %p883_p6 }
  0x62   : > { %p890_p0 = por %p889_p11, %p888_p12 }
  0x64   : > { %699 = vmatpush3.bf16.msra.mxu0 %v813_v2  ;;  %728 = vmatpush3.bf16.msra.mxu1 %v813_v2  ;;  %p891_p5 = pnand %p890_p0, %p884_p8 }
  0x65   : > { %700 = vmatprep.subr.bf16.mxu0 %v814_v3  ;;  %721 = vmatprep.subr.bf16.mxu1 %v814_v3 }
  0x68   : > { %701 = vmatpush3.bf16.msra.mxu0 %v814_v3  ;;  %729 = vmatpush3.bf16.msra.mxu1 %v814_v3 }
  0x69   : > { %702 = vmatprep.subr.bf16.mxu0 %v815_v6  ;;  %722 = vmatprep.subr.bf16.mxu1 %v815_v6 }
  0x6c   : > { %703 = vmatpush3.bf16.msra.mxu0 %v815_v6  ;;  %730 = vmatpush3.bf16.msra.mxu1 %v815_v6 }
  0x6d   : > { %704 = vmatprep.subr.bf16.mxu0 %v816_v7  ;;  %723 = vmatprep.subr.bf16.mxu1 %v816_v7 }
  0x70   : > { %705 = vmatpush3.bf16.msra.mxu0 %v816_v7  ;;  %731 = vmatpush3.bf16.msra.mxu1 %v816_v7 }
  0x71   : > { %706 = vmatprep.subr.bf16.mxu0 %v817_v8  ;;  %724 = vmatprep.subr.bf16.mxu1 %v817_v8 }
  0x74   : > { %707 = vmatpush3.bf16.msra.mxu0 %v817_v8  ;;  %732 = vmatpush3.bf16.msra.mxu1 %v817_v8 }
  0x75   : > { %708 = vmatprep.subr.bf16.mxu0 %v818_v9  ;;  %725 = vmatprep.subr.bf16.mxu1 %v818_v9 }
  0x78   : > { %709 = vmatpush3.bf16.msra.mxu0 %v818_v9  ;;  %733 = vmatpush3.bf16.msra.mxu1 %v818_v9 }
  0x7b   : > { %711 = vmatmul.mubr.bf16.vlgmr.msra.gmra.mrb[0].mxu0 %v821_v10  ;;  %715 = vmatmul.mubr.bf16.vlgmr.msra.gmra.mrb[0].mxu1 %v822_v11 }
 0x14e   : > { %v712_v13 = vpop.f32.mrb[0].mxu0  ;;  %v716_v14 = vpop.f32.mrb[0].mxu1 }
 0x14f   : > { %v448_v15 = vadd.f32 %v712_v13, %v635_v12  ;;  %v452_v16 = vadd.f32 %v716_v14, %v635_v12  ;;  %v381_v17 = vpop.f32.mrb[1].mxu0  ;;  %v397_v18 = vpop.f32.mrb[1].mxu1 }
 0x150   : > { %v446_v19 = vadd.f32 %v635_v12, %v381_v17  ;;  %v450_v20 = vadd.f32 %v635_v12, %v397_v18  ;;  %v713_v21 = vpop.f32.mrb[2].mxu0  ;;  %v717_v22 = vpop.f32.mrb[2].mxu1 }
 0x151   : > { %v449_v23 = vadd.f32 %v713_v21, %v635_v12  ;;  %v453_v24 = vadd.f32 %v717_v22, %v635_v12  ;;  %v384_v25 = vpop.f32.mrb[3].mxu0  ;;  %v400_v26 = vpop.f32.mrb[3].mxu1  ;;  %v456_v29 = vmax.f32 %v448_v15, 0.0  ;;  %v460_v30 = vmax.f32 %v452_v16, 0.0 }
 0x152   : > { %v447_v27 = vadd.f32 %v635_v12, %v384_v25  ;;  %v451_v28 = vadd.f32 %v635_v12, %v400_v26  ;;  %v454_v33 = vmax.f32 %v446_v19, 0.0  ;;  %v458_v34 = vmax.f32 %v450_v20, 0.0 }
 0x153   : > { %v457_v31 = vmax.f32 %v449_v23, 0.0  ;;  %v461_v32 = vmax.f32 %v453_v24, 0.0 }
 0x154   : > { %v455_v35 = vmax.f32 %v447_v27, 0.0  ;;  %v459_v36 = vmax.f32 %v451_v28, 0.0 }
 0x155   : > { %v667_v37 = vpack.c.bf16 %v457_v31, %v456_v29  ;;  %v677_v38 = vpack.c.bf16 %v461_v32, %v460_v30 }
 0x156   : > { %v662_v39 = vpack.c.bf16 %v455_v35, %v454_v33  ;;  %v672_v40 = vpack.c.bf16 %v459_v36, %v458_v34 }
 0x157   : > { %679 = vst [vmem:[%s226_s24 + $0x8] sm:$0xff] %v667_v37   ;;  %681 = vst [vmem:[%s226_s24 + $0x18] sm:$0xff] %v677_v38  }
 0x158   : > { %663 = vst [vmem:[%s226_s24] sm:$0xff] %v662_v39   ;;  %680 = vst [vmem:[%s226_s24 + $0x10] sm:$0xff] %v672_v40  }
 0x159   : > { %894 = shalt.err (!%p891_p5)
}
 0x15a   : > { %s895_s6 = scalar_lea.hbm %s1185_s15, 512  ;;  %s899_s19 = scalar_lea.hbm %s1237_s3, 1024 }
 0x15b   : > { %p896_p9 = scmp.ne.s32.totalorder %s1185_s15, %s895_s6  ;;  %p900_p3 = scmp.lt.u32.totalorder %s1185_s15, %s1237_s3 }
 0x15c   : > { %p901_p7 = scmp.lt.u32.totalorder %s899_s19, %s895_s6  ;;  %p903_p4 = scmp.lt.u32.totalorder %s895_s6, %s1185_s15 }
 0x15d   : > { %p897_p1 = pnand %p896_p9, %p1095_p10 }
 0x15e   : > { %p902_p13 = por %p901_p7, %p900_p3 }
 0x15f   : > { %p898_p2 = pneg %p897_p1 }
 0x160   : > { %p904_p6 = por %p903_p4, %p902_p13 }
 0x162   : > { %p905_p8 = pnand %p904_p6, %p898_p2 }
 0x164   : > { %908 = shalt.err (!%p905_p8)
}
 0x165   : > { %s974_s24 = smov 64   ;;  %s975_s11 = smov 4  }
 0x166   : > { %740 = dma.vmem_to_hbm [thread:$0]  (%p1095_p10), %s1180_s10, 512, %s1185_s15, %s503_s25, %s974_s24, %s974_s24, %s975_s11  }
 0x167 PF: > { %s531_s9 = sand.u32 1, %s947_s12   ;;  %p1255_p12 = scmp.ne.s32.totalorder %s1245_s23, 0 }
 0x168   : > { %p1256_p11 = scmp.ge.s32.totalorder %s967_s17, 2  ;;  %s532_s18 = scalar_lea.sflag [#allocation5], %s531_s9 }
 0x16a   : > { %p751_p0 = pnand %p1256_p11, %p1255_p12 }
 0x16c   : > { %942 = dma.done.wait (!%p751_p0), %s532_s18, 512  }
 0x16d   : > { %944 = vsyncadd (!%p751_p0), %s532_s18, 4294966784  ;;  %s20_s17 = sadd.s32 1, %s967_s17   ;;  %s1257_s12 = smov %s951_s13 }
 0x16e   : > { %p17_p5 = scmp.ge.s32.totalorder %s20_s17, 4   ;;  %s1258_s13 = smov %s955_s14 }
 0x16f   : > { %s1259_s14 = smov %s1104_s5  ;;  %s1260_s15 = smov %s963_s16 }
 0x170   : > { %s1261_s16 = smov %s1263_s28  ;;  %19 = sbr.rel (!%p17_p5) target bundleno = 7 (0x7), region = 90 }
 0x177   :  { %537 = vsyncpa [#allocation4], 1 }
 0x178   :  { %539 = vsyncpa [#allocation4 + $0x1], 1 }
 0x179   :  { %540 = vsyncpa [#allocation7], 1 }
 0x17a   :  { %541 = vsyncpa [#allocation5], 1 }
 0x17b   :  { %543 = vsyncpa [#allocation5 + $0x1], 1 }

</bundles_post_ra>
